<compile_context>
chip_gen: v5e
topology: v5e:2x2
jax: 0.10.0
libtpu: 0.0.40
codegen_flags: <defaults>
</compile_context>

<pallas_src>
import jax
import jax.numpy as jnp
from jax.experimental import pallas as pl
from jax.experimental.pallas import tpu as pltpu

_LANE = 128


def _round_up(x, m):
    return ((x + m - 1) // m) * m


def _cdiv(a, b):
    return (a + b - 1) // b


def _leaky_relu(x, slope=0.01):
    # PyTorch nn.LeakyReLU default negative_slope = 0.01
    return jnp.where(x > 0, x, slope * x)


def invdyn_kernel(x_ref,
                  w1_ref, b1_ref,
                  w2_ref, b2_ref,
                  w3_ref, b3_ref,
                  w4_ref, b4_ref,
                  w5_ref, b5_ref,
                  o_ref):
    # Layer 1: packed bf16 input, single dot, f32 accumulation + f32 bias.
    h = jnp.dot(x_ref[...], w1_ref[...],
                preferred_element_type=jnp.float32) + b1_ref[...]
    h = _leaky_relu(h).astype(jnp.bfloat16)

    # Layer 2 (Dropout(0.15) is identity in eval mode)
    h = jnp.dot(h, w2_ref[...],
                preferred_element_type=jnp.float32) + b2_ref[...]
    h = _leaky_relu(h).astype(jnp.bfloat16)

    # Layer 3 (Dropout identity)
    h = jnp.dot(h, w3_ref[...],
                preferred_element_type=jnp.float32) + b3_ref[...]
    h = _leaky_relu(h).astype(jnp.bfloat16)

    # Layer 4 (Dropout identity; hidden dim zero-padded to a lane multiple)
    h = jnp.dot(h, w4_ref[...],
                preferred_element_type=jnp.float32) + b4_ref[...]
    h = _leaky_relu(h).astype(jnp.bfloat16)

    # Layer 5 + Tanh. Padded columns stay in VMEM; only the real action_dim
    # columns are written back to HBM.
    h = jnp.dot(h, w5_ref[...],
                preferred_element_type=jnp.float32) + b5_ref[...]
    o_ref[...] = jnp.tanh(h[:, : o_ref.shape[1]])


def init_params(key, state_dim, next_state_dim, action_dim):
    """Deterministic synthetic init matching nn.Linear default fan-in scaling.

    Weights stored (in_features, out_features) in bf16 (MXU inputs); biases in
    f32 as (1, out) VMEM tiles. Layers 4/5 dims are zero-padded to a multiple
    of 128 lanes for lane-dense MXU work (the padding never reaches HBM
    output).
    """
    in_dim = state_dim + next_state_dim
    h4 = action_dim * 4
    h4_pad = _round_up(h4, _LANE)
    out_pad = _round_up(action_dim, _LANE)

    def uni(k, shape, scale):
        return jax.random.uniform(k, shape, jnp.float32, -scale, scale)

    keys = jax.random.split(key, 10)
    params = {"action_dim": action_dim}

    s1 = 1.0 / float(jnp.sqrt(jnp.float32(in_dim)))
    params["w1"] = uni(keys[0], (in_dim, 256), s1).astype(jnp.bfloat16)
    params["b1"] = uni(keys[1], (1, 256), s1)

    s2 = 1.0 / float(jnp.sqrt(jnp.float32(256)))
    params["w2"] = uni(keys[2], (256, 256), s2).astype(jnp.bfloat16)
    params["b2"] = uni(keys[3], (1, 256), s2)
    params["w3"] = uni(keys[4], (256, 256), s2).astype(jnp.bfloat16)
    params["b3"] = uni(keys[5], (1, 256), s2)

    w4 = uni(keys[6], (256, h4), s2)
    b4 = uni(keys[7], (1, h4), s2)
    params["w4"] = jnp.pad(w4, ((0, 0), (0, h4_pad - h4))).astype(jnp.bfloat16)
    params["b4"] = jnp.pad(b4, ((0, 0), (0, h4_pad - h4)))

    s5 = 1.0 / float(jnp.sqrt(jnp.float32(h4)))
    w5 = uni(keys[8], (h4, action_dim), s5)
    b5 = uni(keys[9], (1, action_dim), s5)
    params["w5"] = jnp.pad(
        w5, ((0, h4_pad - h4), (0, out_pad - action_dim))).astype(jnp.bfloat16)
    params["b5"] = jnp.pad(b5, ((0, 0), (0, out_pad - action_dim)))

    return params


def _choose_tiling(B, tb_cap):
    """Pick (tile rows, padded batch, grid steps).

    * 16-row alignment keeps bf16 sublane tiling happy at any grid size.
    * tb_cap defaults to 2048 (safe under v5e's 16 MiB scoped VMEM; far under
      v6e/v7x limits).
    * For B >= 32 we force >= 2 grid steps so "parallel" batch sharding keeps
      both v7x TensorCores busy; the extra step is ~free on single-TC chips.
    """
    tb_cap = max(16, _round_up(min(tb_cap, 2048), 16))
    min_steps = 2 if B >= 32 else 1
    n_tiles = max(min_steps, _cdiv(B, tb_cap))
    tb = _round_up(_cdiv(B, n_tiles), 16)
    return tb, tb * n_tiles, n_tiles


def invdyn_forward(state, next_state, params, *, tb=2048):
    """Fused MLP forward. Batch-tiled grid, weight-resident BlockSpecs."""
    B = state.shape[0]
    in_dim = state.shape[1] + next_state.shape[1]
    action_dim = params["action_dim"]
    h4_pad = params["w4"].shape[1]
    out_pad = params["w5"].shape[1]

    tb, b_pad, n_tiles = _choose_tiling(B, tb)

    # Pre-pack state||next_state into a single bf16 slab (fused with batch pad).
    x = jnp.concatenate(
        [state.astype(jnp.bfloat16), next_state.astype(jnp.bfloat16)], axis=1)
    if b_pad != B:
        x = jnp.pad(x, ((0, b_pad - B), (0, 0)))

    def row_spec(width):
        return pl.BlockSpec((tb, width), lambda i: (i, 0))

    def resident_spec(arr):
        # Constant block index -> DMA'd once, stays VMEM-resident across grid.
        return pl.BlockSpec(arr.shape, lambda i: (0, 0))

    flat_params = [params["w1"], params["b1"],
                   params["w2"], params["b2"],
                   params["w3"], params["b3"],
                   params["w4"], params["b4"],
                   params["w5"], params["b5"]]

    in_specs = [row_spec(in_dim)] + [resident_spec(p) for p in flat_params]

    flops = 2 * b_pad * (in_dim * 256 + 256 * 256 + 256 * 256
                         + 256 * h4_pad + h4_pad * out_pad)
    bytes_accessed = (b_pad * in_dim * 2                       # bf16 input
                      + b_pad * action_dim * 4                 # f32 output
                      + sum(int(p.size) * p.dtype.itemsize for p in flat_params))
    cost = pl.CostEstimate(flops=int(flops),
                           transcendentals=int(b_pad * action_dim),
                           bytes_accessed=int(bytes_accessed))

    out = pl.pallas_call(
        invdyn_kernel,
        out_shape=jax.ShapeDtypeStruct((b_pad, action_dim), jnp.float32),
        grid=(n_tiles,),
        in_specs=in_specs,
        out_specs=row_spec(action_dim),
        compiler_params=pltpu.CompilerParams(
            dimension_semantics=("parallel",)),
        cost_estimate=cost,
    )(x, *flat_params)

    return out[:B]


def reference_forward(state, next_state, params):
    """Pure-JAX reference performing the identical bf16-matmul / f32 math."""
    action_dim = params["action_dim"]

    x = jnp.concatenate(
        [state.astype(jnp.bfloat16), next_state.astype(jnp.bfloat16)], axis=1)

    def layer(h, w, b):
        acc = jnp.dot(h, w, preferred_element_type=jnp.float32) + b
        return _leaky_relu(acc).astype(jnp.bfloat16)

    h = layer(x, params["w1"], params["b1"])
    h = layer(h, params["w2"], params["b2"])
    h = layer(h, params["w3"], params["b3"])
    h = layer(h, params["w4"], params["b4"])
    h = jnp.dot(h, params["w5"], preferred_element_type=jnp.float32) + params["b5"]
    return jnp.tanh(h[:, :action_dim])


if __name__ == "__main__":
    key = jax.random.PRNGKey(0)

    batch = 8
    state_dim = 16
    next_state_dim = 16
    action_dim = 8

    k1, k2, k3 = jax.random.split(key, 3)
    state = jax.random.normal(k1, (batch, state_dim), jnp.float32)
    next_state = jax.random.normal(k2, (batch, next_state_dim), jnp.float32)
    params = init_params(k3, state_dim, next_state_dim, action_dim)

    out = invdyn_forward(state, next_state, params)
    out = jax.block_until_ready(out)

    ref = reference_forward(state, next_state, params)
    assert out.shape == (batch, action_dim)
    assert jnp.allclose(out, ref, atol=1e-4, rtol=1e-4), "mismatch vs JAX reference"

    # TODO(synk): Predict_net / predict() of InvDyn_consis_add is not part of
    # forward() and is not implemented here; Dropout(0.15) is treated as
    # identity (eval mode) — training parity would need pltpu.prng_* masks.

    print("KERNEL_OK")
</pallas_src>

<mosaic_0001>
module attributes {stable_mosaic.version = 11 : i64} {
  func.func @invdyn_kernel(%arg0: i32, %arg1: memref<16x32xbf16, #tpu.memory_space<vmem>>, %arg2: memref<32x256xbf16, #tpu.memory_space<vmem>>, %arg3: memref<1x256xf32, #tpu.memory_space<vmem>>, %arg4: memref<256x256xbf16, #tpu.memory_space<vmem>>, %arg5: memref<1x256xf32, #tpu.memory_space<vmem>>, %arg6: memref<256x256xbf16, #tpu.memory_space<vmem>>, %arg7: memref<1x256xf32, #tpu.memory_space<vmem>>, %arg8: memref<256x128xbf16, #tpu.memory_space<vmem>>, %arg9: memref<1x128xf32, #tpu.memory_space<vmem>>, %arg10: memref<128x128xbf16, #tpu.memory_space<vmem>>, %arg11: memref<1x128xf32, #tpu.memory_space<vmem>>, %arg12: memref<16x8xf32, #tpu.memory_space<vmem>>) attributes {dimension_semantics = [#tpu.dimension_semantics<parallel>], iteration_bounds = array<i64: 1>, scalar_prefetch = 0 : i64, scratch_operands = 0 : i64, tpu.core_type = #tpu.core_type<tc>, window_params = [{transform_indices = @transform_0, window_bounds = array<i64: 16, 32>}, {pipeline_mode = #tpu.pipeline_mode<synchronous>, transform_indices = @transform_1, window_bounds = array<i64: 32, 256>}, {pipeline_mode = #tpu.pipeline_mode<synchronous>, transform_indices = @transform_2, window_bounds = array<i64: 1, 256>}, {pipeline_mode = #tpu.pipeline_mode<synchronous>, transform_indices = @transform_3, window_bounds = array<i64: 256, 256>}, {pipeline_mode = #tpu.pipeline_mode<synchronous>, transform_indices = @transform_4, window_bounds = array<i64: 1, 256>}, {pipeline_mode = #tpu.pipeline_mode<synchronous>, transform_indices = @transform_5, window_bounds = array<i64: 256, 256>}, {pipeline_mode = #tpu.pipeline_mode<synchronous>, transform_indices = @transform_6, window_bounds = array<i64: 1, 256>}, {pipeline_mode = #tpu.pipeline_mode<synchronous>, transform_indices = @transform_7, window_bounds = array<i64: 256, 128>}, {pipeline_mode = #tpu.pipeline_mode<synchronous>, transform_indices = @transform_8, window_bounds = array<i64: 1, 128>}, {pipeline_mode = #tpu.pipeline_mode<synchronous>, transform_indices = @transform_9, window_bounds = array<i64: 128, 128>}, {pipeline_mode = #tpu.pipeline_mode<synchronous>, transform_indices = @transform_10, window_bounds = array<i64: 1, 128>}, {transform_indices = @transform_11, window_bounds = array<i64: 16, 8>}]} {
    %c0 = arith.constant 0 : index
    %c0_0 = arith.constant 0 : index
    %0 = vector.load %arg1[%c0, %c0_0] : memref<16x32xbf16, #tpu.memory_space<vmem>>, vector<16x32xbf16>
    %c0_1 = arith.constant 0 : index
    %c0_2 = arith.constant 0 : index
    %1 = vector.load %arg2[%c0_1, %c0_2] : memref<32x256xbf16, #tpu.memory_space<vmem>>, vector<32x256xbf16>
    %cst = arith.constant dense<0.000000e+00> : vector<16x256xf32>
    %2 = tpu.matmul %0, %1, %cst {dimension_numbers = #tpu.dot_dimension_numbers<[1], [0], [0], [1], [0, 0, 1, 1], [], []>} : vector<16x32xbf16>, vector<32x256xbf16>, vector<16x256xf32> -> vector<16x256xf32>
    %c0_3 = arith.constant 0 : index
    %c0_4 = arith.constant 0 : index
    %3 = vector.load %arg3[%c0_3, %c0_4] : memref<1x256xf32, #tpu.memory_space<vmem>>, vector<1x256xf32>
    %4 = vector.broadcast %3 : vector<1x256xf32> to vector<16x256xf32>
    %5 = arith.addf %2, %4 : vector<16x256xf32>
    %cst_5 = arith.constant 0.000000e+00 : f32
    %6 = vector.broadcast %cst_5 : f32 to vector<16x256xf32>
    %7 = arith.cmpf ogt, %5, %6 : vector<16x256xf32>
    %cst_6 = arith.constant 0.00999999977 : f32
    %8 = vector.broadcast %cst_6 : f32 to vector<16x256xf32>
    %9 = arith.mulf %8, %5 : vector<16x256xf32>
    %10 = arith.select %7, %5, %9 : vector<16x256xi1>, vector<16x256xf32>
    %11 = arith.truncf %10 : vector<16x256xf32> to vector<16x256xbf16>
    %c0_7 = arith.constant 0 : index
    %c0_8 = arith.constant 0 : index
    %12 = vector.load %arg4[%c0_7, %c0_8] : memref<256x256xbf16, #tpu.memory_space<vmem>>, vector<256x256xbf16>
    %cst_9 = arith.constant dense<0.000000e+00> : vector<16x256xf32>
    %13 = tpu.matmul %11, %12, %cst_9 {dimension_numbers = #tpu.dot_dimension_numbers<[1], [0], [0], [1], [0, 0, 1, 1], [], []>} : vector<16x256xbf16>, vector<256x256xbf16>, vector<16x256xf32> -> vector<16x256xf32>
    %c0_10 = arith.constant 0 : index
    %c0_11 = arith.constant 0 : index
    %14 = vector.load %arg5[%c0_10, %c0_11] : memref<1x256xf32, #tpu.memory_space<vmem>>, vector<1x256xf32>
    %15 = vector.broadcast %14 : vector<1x256xf32> to vector<16x256xf32>
    %16 = arith.addf %13, %15 : vector<16x256xf32>
    %cst_12 = arith.constant 0.000000e+00 : f32
    %17 = vector.broadcast %cst_12 : f32 to vector<16x256xf32>
    %18 = arith.cmpf ogt, %16, %17 : vector<16x256xf32>
    %cst_13 = arith.constant 0.00999999977 : f32
    %19 = vector.broadcast %cst_13 : f32 to vector<16x256xf32>
    %20 = arith.mulf %19, %16 : vector<16x256xf32>
    %21 = arith.select %18, %16, %20 : vector<16x256xi1>, vector<16x256xf32>
    %22 = arith.truncf %21 : vector<16x256xf32> to vector<16x256xbf16>
    %c0_14 = arith.constant 0 : index
    %c0_15 = arith.constant 0 : index
    %23 = vector.load %arg6[%c0_14, %c0_15] : memref<256x256xbf16, #tpu.memory_space<vmem>>, vector<256x256xbf16>
    %cst_16 = arith.constant dense<0.000000e+00> : vector<16x256xf32>
    %24 = tpu.matmul %22, %23, %cst_16 {dimension_numbers = #tpu.dot_dimension_numbers<[1], [0], [0], [1], [0, 0, 1, 1], [], []>} : vector<16x256xbf16>, vector<256x256xbf16>, vector<16x256xf32> -> vector<16x256xf32>
    %c0_17 = arith.constant 0 : index
    %c0_18 = arith.constant 0 : index
    %25 = vector.load %arg7[%c0_17, %c0_18] : memref<1x256xf32, #tpu.memory_space<vmem>>, vector<1x256xf32>
    %26 = vector.broadcast %25 : vector<1x256xf32> to vector<16x256xf32>
    %27 = arith.addf %24, %26 : vector<16x256xf32>
    %cst_19 = arith.constant 0.000000e+00 : f32
    %28 = vector.broadcast %cst_19 : f32 to vector<16x256xf32>
    %29 = arith.cmpf ogt, %27, %28 : vector<16x256xf32>
    %cst_20 = arith.constant 0.00999999977 : f32
    %30 = vector.broadcast %cst_20 : f32 to vector<16x256xf32>
    %31 = arith.mulf %30, %27 : vector<16x256xf32>
    %32 = arith.select %29, %27, %31 : vector<16x256xi1>, vector<16x256xf32>
    %33 = arith.truncf %32 : vector<16x256xf32> to vector<16x256xbf16>
    %c0_21 = arith.constant 0 : index
    %c0_22 = arith.constant 0 : index
    %34 = vector.load %arg8[%c0_21, %c0_22] : memref<256x128xbf16, #tpu.memory_space<vmem>>, vector<256x128xbf16>
    %cst_23 = arith.constant dense<0.000000e+00> : vector<16x128xf32>
    %35 = tpu.matmul %33, %34, %cst_23 {dimension_numbers = #tpu.dot_dimension_numbers<[1], [0], [0], [1], [0, 0, 1, 1], [], []>} : vector<16x256xbf16>, vector<256x128xbf16>, vector<16x128xf32> -> vector<16x128xf32>
    %c0_24 = arith.constant 0 : index
    %c0_25 = arith.constant 0 : index
    %36 = vector.load %arg9[%c0_24, %c0_25] : memref<1x128xf32, #tpu.memory_space<vmem>>, vector<1x128xf32>
    %37 = vector.broadcast %36 : vector<1x128xf32> to vector<16x128xf32>
    %38 = arith.addf %35, %37 : vector<16x128xf32>
    %cst_26 = arith.constant 0.000000e+00 : f32
    %39 = vector.broadcast %cst_26 : f32 to vector<16x128xf32>
    %40 = arith.cmpf ogt, %38, %39 : vector<16x128xf32>
    %cst_27 = arith.constant 0.00999999977 : f32
    %41 = vector.broadcast %cst_27 : f32 to vector<16x128xf32>
    %42 = arith.mulf %41, %38 : vector<16x128xf32>
    %43 = arith.select %40, %38, %42 : vector<16x128xi1>, vector<16x128xf32>
    %44 = arith.truncf %43 : vector<16x128xf32> to vector<16x128xbf16>
    %c0_28 = arith.constant 0 : index
    %c0_29 = arith.constant 0 : index
    %45 = vector.load %arg10[%c0_28, %c0_29] : memref<128x128xbf16, #tpu.memory_space<vmem>>, vector<128x128xbf16>
    %cst_30 = arith.constant dense<0.000000e+00> : vector<16x128xf32>
    %46 = tpu.matmul %44, %45, %cst_30 {dimension_numbers = #tpu.dot_dimension_numbers<[1], [0], [0], [1], [0, 0, 1, 1], [], []>} : vector<16x128xbf16>, vector<128x128xbf16>, vector<16x128xf32> -> vector<16x128xf32>
    %c0_31 = arith.constant 0 : index
    %c0_32 = arith.constant 0 : index
    %47 = vector.load %arg11[%c0_31, %c0_32] : memref<1x128xf32, #tpu.memory_space<vmem>>, vector<1x128xf32>
    %48 = vector.broadcast %47 : vector<1x128xf32> to vector<16x128xf32>
    %49 = arith.addf %46, %48 : vector<16x128xf32>
    %50 = vector.extract_strided_slice %49 {offsets = [0, 0], sizes = [16, 8], strides = [1, 1]} : vector<16x128xf32> to vector<16x8xf32>
    %51 = math.tanh %50 : vector<16x8xf32>
    %c0_33 = arith.constant 0 : index
    %c0_34 = arith.constant 0 : index
    %52 = vector.load %arg12[%c0_33, %c0_34] : memref<16x8xf32, #tpu.memory_space<vmem>>, vector<16x8xf32>
    tpu.vector_store %arg12[%c0_33, %c0_34], %51 {strides = array<i32>} : memref<16x8xf32, #tpu.memory_space<vmem>>, vector<16x8xf32>,
    return
  }
  func.func @transform_0(%arg0: i32) -> (i32, i32) {
    %c0_i32 = arith.constant 0 : i32
    %c0_i32_0 = arith.constant 0 : i32
    return %arg0, %c0_i32 : i32, i32
  }
  func.func @transform_1(%arg0: i32) -> (i32, i32) {
    %c0_i32 = arith.constant 0 : i32
    %c0_i32_0 = arith.constant 0 : i32
    %c0_i32_1 = arith.constant 0 : i32
    return %c0_i32, %c0_i32_0 : i32, i32
  }
  func.func @transform_2(%arg0: i32) -> (i32, i32) {
    %c0_i32 = arith.constant 0 : i32
    %c0_i32_0 = arith.constant 0 : i32
    %c0_i32_1 = arith.constant 0 : i32
    return %c0_i32, %c0_i32_0 : i32, i32
  }
  func.func @transform_3(%arg0: i32) -> (i32, i32) {
    %c0_i32 = arith.constant 0 : i32
    %c0_i32_0 = arith.constant 0 : i32
    %c0_i32_1 = arith.constant 0 : i32
    return %c0_i32, %c0_i32_0 : i32, i32
  }
  func.func @transform_4(%arg0: i32) -> (i32, i32) {
    %c0_i32 = arith.constant 0 : i32
    %c0_i32_0 = arith.constant 0 : i32
    %c0_i32_1 = arith.constant 0 : i32
    return %c0_i32, %c0_i32_0 : i32, i32
  }
  func.func @transform_5(%arg0: i32) -> (i32, i32) {
    %c0_i32 = arith.constant 0 : i32
    %c0_i32_0 = arith.constant 0 : i32
    %c0_i32_1 = arith.constant 0 : i32
    return %c0_i32, %c0_i32_0 : i32, i32
  }
  func.func @transform_6(%arg0: i32) -> (i32, i32) {
    %c0_i32 = arith.constant 0 : i32
    %c0_i32_0 = arith.constant 0 : i32
    %c0_i32_1 = arith.constant 0 : i32
    return %c0_i32, %c0_i32_0 : i32, i32
  }
  func.func @transform_7(%arg0: i32) -> (i32, i32) {
    %c0_i32 = arith.constant 0 : i32
    %c0_i32_0 = arith.constant 0 : i32
    %c0_i32_1 = arith.constant 0 : i32
    return %c0_i32, %c0_i32_0 : i32, i32
  }
  func.func @transform_8(%arg0: i32) -> (i32, i32) {
    %c0_i32 = arith.constant 0 : i32
    %c0_i32_0 = arith.constant 0 : i32
    %c0_i32_1 = arith.constant 0 : i32
    return %c0_i32, %c0_i32_0 : i32, i32
  }
  func.func @transform_9(%arg0: i32) -> (i32, i32) {
    %c0_i32 = arith.constant 0 : i32
    %c0_i32_0 = arith.constant 0 : i32
    %c0_i32_1 = arith.constant 0 : i32
    return %c0_i32, %c0_i32_0 : i32, i32
  }
  func.func @transform_10(%arg0: i32) -> (i32, i32) {
    %c0_i32 = arith.constant 0 : i32
    %c0_i32_0 = arith.constant 0 : i32
    %c0_i32_1 = arith.constant 0 : i32
    return %c0_i32, %c0_i32_0 : i32, i32
  }
  func.func @transform_11(%arg0: i32) -> (i32, i32) {
    %c0_i32 = arith.constant 0 : i32
    %c0_i32_0 = arith.constant 0 : i32
    return %arg0, %c0_i32 : i32, i32
  }
}

</mosaic_0001>

<bundles_post_ra>
// kernel: tpu_custom_call.1
= control target key start
LH: loop header
LB: loop body
LE: loop exit
PB: predicated region body
PF: predicated region fallthrough
CT: control target
= control target key end

     0   :  { %16 = vsyncpa [#allocation3], 0  ;;  %s1808_s0 = inlined_call_operand.hbm [shape: bf16[16,32], index: 0, kind: input, shape index: {}]   ;;  %s1809_s1 = inlined_call_operand.hbm [shape: bf16[32,256], index: 1, kind: input, shape index: {}]   ;;  %s1810_s2 = inlined_call_operand.hbm [shape: f32[1,256], index: 2, kind: input, shape index: {}]   ;;  %s1811_s3 = inlined_call_operand.hbm [shape: bf16[256,256], index: 3, kind: input, shape index: {}]   ;;  %s1812_s4 = inlined_call_operand.vmem [shape: f32[1,256], index: 4, kind: input, shape index: {}]   ;;  %s1813_s5 = inlined_call_operand.hbm [shape: bf16[256,256], index: 5, kind: input, shape index: {}]   ;;  %s1814_s6 = inlined_call_operand.vmem [shape: f32[1,256], index: 6, kind: input, shape index: {}]   ;;  %s1815_s7 = inlined_call_operand.hbm [shape: bf16[256,128], index: 7, kind: input, shape index: {}]   ;;  %s1816_s8 = inlined_call_operand.vmem [shape: f32[1,128], index: 8, kind: input, shape index: {}]   ;;  %s1817_s9 = inlined_call_operand.hbm [shape: bf16[128,128], index: 9, kind: input, shape index: {}]   ;;  %s1818_s10 = inlined_call_operand.vmem [shape: f32[1,128], index: 10, kind: input, shape index: {}]   ;;  %s1819_s11 = inlined_call_operand.vmem [shape: f32[16,8], index: 11, kind: output, shape index: {}]  }
   0x1   :  { %17 = vsyncpa [#allocation5], 0 }
   0x2   :  { %18 = vsyncpa [#allocation8], 0  ;;  %s37_s19 = sshll.u32 %s1809_s1, 4  ;;  %s38_s19 = int_to_ptr.hbm [resolvable:$true] %s37_s19 }
   0x3   :  { %19 = vsyncpa [#allocation11], 0  ;;  %s1687_s20 = smov [#allocation4]   ;;  %s61_s24 = sshll.u32 %s1811_s3, 4  ;;  %s62_s24 = int_to_ptr.hbm [resolvable:$true] %s61_s24 }
   0x4   :  { %s39_s21 = sshll.u32 %s1687_s20, 4  ;;  %s1688_s25 = smov 128   ;;  %s40_s21 = int_to_ptr.vmem [resolvable:$true] %s39_s21 }
   0x5   :  { %s1689_s26 = smov 8   ;;  %s1690_s27 = smov [#allocation7]  }
   0x6   :  { %45 = dma.hbm_to_vmem [thread:$0]  %s38_s19, 512, %s40_s21, [#allocation5], %s1688_s25, %s1688_s25, %s1689_s26  }
   0x7   :  { %s63_s28 = sshll.u32 %s1690_s27, 4  ;;  %s91_s30 = sshll.u32 %s1815_s7, 4  ;;  %s64_s28 = int_to_ptr.vmem [resolvable:$true] %s63_s28  ;;  %s92_s30 = int_to_ptr.hbm [resolvable:$true] %s91_s30 }
   0x8   :  { %69 = dma.hbm_to_vmem [thread:$0]  %s62_s24, 4096, %s64_s28, [#allocation8], %s1688_s25, %s1688_s25, %s1689_s26  }
   0x9   :  { %s1691_s3 = smov [#allocation10]   ;;  %s24_s15 = sshll.u32 %s1808_s0, 4  ;;  %s25_s15 = int_to_ptr.hbm [resolvable:$true] %s24_s15 }
   0xa   :  { %s93_s12 = sshll.u32 %s1691_s3, 4  ;;  %s1692_s16 = smov 64   ;;  %s94_s12 = int_to_ptr.vmem [resolvable:$true] %s93_s12 }
   0xb   :  { %s1693_s17 = smov 4   ;;  %s1694_s18 = smov [#allocation2]  }
   0xc   :  { %99 = dma.hbm_to_vmem [thread:$0]  %s92_s30, 2048, %s94_s12, [#allocation11], %s1692_s16, %s1692_s16, %s1693_s17  }
   0xd   :  { %s26_s19 = sshll.u32 %s1694_s18, 4  ;;  %s51_s22 = sshll.u32 %s1810_s2, 4  ;;  %s27_s19 = int_to_ptr.vmem [resolvable:$true] %s26_s19  ;;  %s52_s22 = int_to_ptr.hbm [resolvable:$true] %s51_s22 }
   0xe   :  { %32 = dma.hbm_to_vmem [thread:$0]  %s25_s15, 128, %s27_s19, [#allocation3], %s1692_s16, %s1692_s16, %s1693_s17  }
   0xf   :  { %s76_s24 = sshll.u32 %s1813_s5, 4  ;;  %s1695_s27 = smov [#allocation6]   ;;  %s77_s24 = int_to_ptr.hbm [resolvable:$true] %s76_s24 }
  0x10   :  { %s53_s28 = sshll.u32 %s1695_s27, 4  ;;  %s1696_s0 = smov [#allocation9]   ;;  %s54_s28 = int_to_ptr.vmem [resolvable:$true] %s53_s28 }
  0x11   :  { %56 = dma.hbm_to_vmem [thread:$0]  %s52_s22, 32, %s54_s28, [#allocation5]  }
  0x12   :  { %s78_s1 = sshll.u32 %s1696_s0, 4  ;;  %s106_s3 = sshll.u32 %s1817_s9, 4  ;;  %s79_s1 = int_to_ptr.vmem [resolvable:$true] %s78_s1  ;;  %s107_s3 = int_to_ptr.hbm [resolvable:$true] %s106_s3 }
  0x13   :  { %84 = dma.hbm_to_vmem [thread:$0]  %s77_s24, 4096, %s79_s1, [#allocation8], %s1688_s25, %s1688_s25, %s1689_s26  }
  0x14   :  { %s1697_s2 = smov [#allocation12]  }
  0x15   :  { %s108_s12 = sshll.u32 %s1697_s2, 4  ;;  %s109_s12 = int_to_ptr.vmem [resolvable:$true] %s108_s12 }
  0x16   :  { %114 = dma.hbm_to_vmem [thread:$0]  %s107_s3, 1024, %s109_s12, [#allocation11], %s1692_s16, %s1692_s16, %s1693_s17  }
  0x17   :  { %1679 = dma.done.wait [#allocation3], 128  }
  0x18   :  { %1680 = vsyncadd [#allocation3], 4294967168 }
  0x19   :  { %1681 = dma.done.wait [#allocation5], 544  }
  0x1a   :  { %1682 = vsyncadd [#allocation5], 4294966752 }
  0x1b   :  { %1683 = dma.done.wait [#allocation8], 8192  }
  0x1c   :  { %1684 = vsyncadd [#allocation8], 4294959104 }
  0x1d   :  { %1685 = dma.done.wait [#allocation11], 3072  }
  0x1e   :  { %1686 = vsyncadd [#allocation11], 4294964224  ;;  %v1041_v0 = vld [vmem:[#allocation4 + $0x10] sm:$0xf]  ;;  %v1405_v1 = vld [vmem:[#allocation4 + $0x14] sm:$0xf0] }
  0x1f   :  { %v1033_v2 = vld [vmem:[#allocation4] sm:$0xf]  ;;  %v1042_v3 = vor.u32 %v1405_v1, %v1041_v0  ;;  %v1403_v4 = vld [vmem:[#allocation4 + $0x4] sm:$0xf0]  ;;  %v1404_v5 = vld [vmem:[#allocation4 + $0x14] sm:$0xf] }
  0x20   :  { %v1043_v6 = vld [vmem:[#allocation4 + $0x18] sm:$0xf0]  ;;  %v1034_v7 = vor.u32 %v1403_v4, %v1033_v2  ;;  %v1402_v8 = vld [vmem:[#allocation4 + $0x4] sm:$0xf]  ;;  %v1107_v9 = vld [vmem:[#allocation7 + $0x70] sm:$0xf] }
  0x21   :  { %193 = vmatpush.bf16.msra.mxu1 %v1042_v3  ;;  %v1421_v10 = vld [vmem:[#allocation7 + $0x74] sm:$0xf0]  ;;  %v1420_v11 = vld [vmem:[#allocation7 + $0x74] sm:$0xf]  ;;  %v1046_v12 = vor.u32 %v1404_v5, %v1043_v6  ;;  %v1109_v14 = vld [vmem:[#allocation7 + $0x78] sm:$0xf0] }
  0x22   :  { %v1108_v13 = vor.u32 %v1421_v10, %v1107_v9  ;;  %v1099_v15 = vld [vmem:[#allocation7 + $0x60] sm:$0xf]  ;;  %v1419_v16 = vld [vmem:[#allocation7 + $0x64] sm:$0xf0]  ;;  %v1112_v18 = vor.u32 %v1420_v11, %v1109_v14  ;;  %v1418_v19 = vld [vmem:[#allocation7 + $0x64] sm:$0xf] }
  0x23   :  { %v1035_v17 = vld [vmem:[#allocation4 + $0x8] sm:$0xf0]  ;;  %v1401_v21 = vld [vmem:[#allocation2] sm:$0xff]  ;;  %v1100_v22 = vor.u32 %v1419_v16, %v1099_v15  ;;  %vm183_vm0 = vcmask 261120   ;;  %v1091_v24 = vld [vmem:[#allocation7 + $0x50] sm:$0xf] }
  0x24   :  { %v1101_v20 = vld [vmem:[#allocation7 + $0x68] sm:$0xf0]  ;;  %427 = vmatpush.bf16.msra.mxu2 %v1108_v13  ;;  %455 = vmatpush.bf16.msra.mxu0 %v1112_v18  ;;  %v1417_v25 = vld [vmem:[#allocation7 + $0x54] sm:$0xf0]  ;;  %v1038_v26 = vor.u32 %v1402_v8, %v1035_v17  ;;  %v1416_v27 = vld [vmem:[#allocation7 + $0x54] sm:$0xf] }
  0x25   :  { %194 = vmatpush.bf16.msra.mxu1 %v1034_v7  ;;  %v1104_v23 = vor.u32 %v1418_v19, %v1101_v20  ;;  %v1093_v28 = vld [vmem:[#allocation7 + $0x58] sm:$0xf0]  ;;  %v1092_v29 = vor.u32 %v1417_v25, %v1091_v24  ;;  %v1083_v31 = vld [vmem:[#allocation7 + $0x40] sm:$0xf]  ;;  %v1415_v32 = vld [vmem:[#allocation7 + $0x44] sm:$0xf0] }
  0x26   :  { %v1096_v30 = vor.u32 %v1416_v27, %v1093_v28  ;;  %v1414_v33 = vld [vmem:[#allocation7 + $0x44] sm:$0xf]  ;;  %v1085_v34 = vld [vmem:[#allocation7 + $0x48] sm:$0xf0]  ;;  %v1084_v35 = vor.u32 %v1415_v32, %v1083_v31  ;;  %v1075_v37 = vld [vmem:[#allocation7 + $0x30] sm:$0xf] }
  0x27   :  { %v1088_v36 = vor.u32 %v1414_v33, %v1085_v34  ;;  %v1413_v38 = vld [vmem:[#allocation7 + $0x34] sm:$0xf0]  ;;  %v1171_v39 = vld [vmem:[#allocation7 + $0xf0] sm:$0xf]  ;;  %v1412_v42 = vld [vmem:[#allocation7 + $0x34] sm:$0xf] }
  0x28   :  { %1047 = vmatmul.msk.bf16.vlgmr.msra.gmra.mxu1 %vm183_vm0, %v1401_v21  ;;  %428 = vmatpush.bf16.msra.mxu2 %v1100_v22  ;;  %v1076_v40 = vor.u32 %v1413_v38, %v1075_v37  ;;  %v1437_v41 = vld [vmem:[#allocation7 + $0xf4] sm:$0xf0]  ;;  %v1077_v43 = vld [vmem:[#allocation7 + $0x38] sm:$0xf0]  ;;  %v1436_v46 = vld [vmem:[#allocation7 + $0xf4] sm:$0xf] }
  0x29   :  { %207 = vmatpush.bf16.msrb.mxu1 %v1046_v12  ;;  %456 = vmatpush.bf16.msra.mxu0 %v1104_v23  ;;  %v1172_v44 = vor.u32 %v1437_v41, %v1171_v39  ;;  %v1080_v45 = vor.u32 %v1412_v42, %v1077_v43  ;;  %v1173_v47 = vld [vmem:[#allocation7 + $0xf8] sm:$0xf0]  ;;  %v1067_v49 = vld [vmem:[#allocation7 + $0x20] sm:$0xf]  ;;  %v1411_v50 = vld [vmem:[#allocation7 + $0x24] sm:$0xf0] }
  0x2a   :  { %v1176_v48 = vor.u32 %v1436_v46, %v1173_v47  ;;  %v1163_v51 = vld [vmem:[#allocation7 + $0xe0] sm:$0xf]  ;;  %v1068_v52 = vor.u32 %v1411_v50, %v1067_v49  ;;  %v1435_v53 = vld [vmem:[#allocation7 + $0xe4] sm:$0xf0]  ;;  %v1410_v54 = vld [vmem:[#allocation7 + $0x24] sm:$0xf] }
  0x2b   :  { %441 = vmatpush.bf16.msra.mxu3 %v1172_v44  ;;  %v1069_v55 = vld [vmem:[#allocation7 + $0x28] sm:$0xf0]  ;;  %v1164_v56 = vor.u32 %v1435_v53, %v1163_v51  ;;  %v1434_v58 = vld [vmem:[#allocation7 + $0xe4] sm:$0xf]  ;;  %v1059_v61 = vld [vmem:[#allocation7 + $0x10] sm:$0xf] }
  0x2c   :  { %429 = vmatpush.bf16.msra.mxu2 %v1092_v29  ;;  %v1072_v57 = vor.u32 %v1410_v54, %v1069_v55  ;;  %v1165_v59 = vld [vmem:[#allocation7 + $0xe8] sm:$0xf0]  ;;  %v1409_v62 = vld [vmem:[#allocation7 + $0x14] sm:$0xf0]  ;;  %v1155_v63 = vld [vmem:[#allocation7 + $0xd0] sm:$0xf] }
  0x2d   :  { %208 = vmatpush.bf16.msrb.mxu1 %v1038_v26  ;;  %457 = vmatpush.bf16.msra.mxu0 %v1096_v30  ;;  %v1168_v60 = vor.u32 %v1434_v58, %v1165_v59  ;;  %v1060_v0 = vor.u32 %v1409_v62, %v1059_v61  ;;  %v1433_v1 = vld [vmem:[#allocation7 + $0xd4] sm:$0xf0]  ;;  %v1408_v2 = vld [vmem:[#allocation7 + $0x14] sm:$0xf]  ;;  %v1061_v3 = vld [vmem:[#allocation7 + $0x18] sm:$0xf0] }
  0x2e   :  { %v1156_v4 = vor.u32 %v1433_v1, %v1155_v63  ;;  %v1064_v5 = vor.u32 %v1408_v2, %v1061_v3  ;;  %v1432_v6 = vld [vmem:[#allocation7 + $0xd4] sm:$0xf]  ;;  %v1157_v7 = vld [vmem:[#allocation7 + $0xd8] sm:$0xf0]  ;;  %v1051_v9 = vld [vmem:[#allocation7] sm:$0xf] }
  0x2f   :  { %442 = vmatpush.bf16.msra.mxu3 %v1164_v56  ;;  %v1160_v8 = vor.u32 %v1432_v6, %v1157_v7  ;;  %v1407_v10 = vld [vmem:[#allocation7 + $0x4] sm:$0xf0]  ;;  %v1147_v11 = vld [vmem:[#allocation7 + $0xc0] sm:$0xf]  ;;  %v1406_v14 = vld [vmem:[#allocation7 + $0x4] sm:$0xf] }
  0x30   :  { %430 = vmatpush.bf16.msra.mxu2 %v1084_v35  ;;  %v1052_v12 = vor.u32 %v1407_v10, %v1051_v9  ;;  %v1431_v13 = vld [vmem:[#allocation7 + $0xc4] sm:$0xf0]  ;;  %v1053_v15 = vld [vmem:[#allocation7 + $0x8] sm:$0xf0]  ;;  %v1430_v18 = vld [vmem:[#allocation7 + $0xc4] sm:$0xf] }
  0x31   :  { %458 = vmatpush.bf16.msra.mxu0 %v1088_v36  ;;  %469 = vmatpush.bf16.msra.mxu1 %v1176_v48  ;;  %v1148_v16 = vor.u32 %v1431_v13, %v1147_v11  ;;  %v1056_v17 = vor.u32 %v1406_v14, %v1053_v15  ;;  %v1149_v19 = vld [vmem:[#allocation7 + $0xc8] sm:$0xf0]  ;;  %v1429_v22 = vld [vmem:[#allocation7 + $0xb4] sm:$0xf0]  ;;  %v1428_v23 = vld [vmem:[#allocation7 + $0xb4] sm:$0xf] }
  0x32   :  { %v1152_v20 = vor.u32 %v1430_v18, %v1149_v19  ;;  %v1141_v25 = vld [vmem:[#allocation7 + $0xb8] sm:$0xf0]  ;;  %v1131_v27 = vld [vmem:[#allocation7 + $0xa0] sm:$0xf]  ;;  %v1427_v28 = vld [vmem:[#allocation7 + $0xa4] sm:$0xf0] }
  0x33   :  { %443 = vmatpush.bf16.msra.mxu3 %v1156_v4  ;;  %v1144_v26 = vor.u32 %v1428_v23, %v1141_v25  ;;  %v1426_v29 = vld [vmem:[#allocation7 + $0xa4] sm:$0xf]  ;;  %v1132_v30 = vor.u32 %v1427_v28, %v1131_v27  ;;  %v1133_v31 = vld [vmem:[#allocation7 + $0xa8] sm:$0xf0]  ;;  %v1123_v33 = vld [vmem:[#allocation7 + $0x90] sm:$0xf] }
  0x34   :  { %431 = vmatpush.bf16.msra.mxu2 %v1076_v40  ;;  %v1136_v32 = vor.u32 %v1426_v29, %v1133_v31  ;;  %v1425_v34 = vld [vmem:[#allocation7 + $0x94] sm:$0xf0]  ;;  %v1424_v35 = vld [vmem:[#allocation7 + $0x94] sm:$0xf]  ;;  %v1125_v37 = vld [vmem:[#allocation7 + $0x98] sm:$0xf0] }
  0x35   :  { %459 = vmatpush.bf16.msra.mxu0 %v1080_v45  ;;  %470 = vmatpush.bf16.msra.mxu1 %v1168_v60  ;;  %v1124_v36 = vor.u32 %v1425_v34, %v1123_v33  ;;  %v1128_v38 = vor.u32 %v1424_v35, %v1125_v37  ;;  %v1115_v39 = vld [vmem:[#allocation7 + $0x80] sm:$0xf]  ;;  %v1423_v40 = vld [vmem:[#allocation7 + $0x84] sm:$0xf0]  ;;  %v1422_v41 = vld [vmem:[#allocation7 + $0x84] sm:$0xf] }
  0x36   :  { %v1116_v42 = vor.u32 %v1423_v40, %v1115_v39  ;;  %v1117_v43 = vld [vmem:[#allocation7 + $0x88] sm:$0xf0]  ;;  %v152_v45 = vld [vmem:[#allocation6] sm:$0x3]  ;;  %v1299_v2 = vld [vmem:[#allocation9 + $0xf0] sm:$0xf] }
  0x37   :  { %444 = vmatpush.bf16.msra.mxu3 %v1148_v16  ;;  %v1120_v44 = vor.u32 %v1422_v41, %v1117_v43  ;;  %v154_v47 = vperm.slane %v152_v45, 0  ;;  %v1469_v3 = vld [vmem:[#allocation9 + $0xf4] sm:$0xf0]  ;;  %v1468_v4 = vld [vmem:[#allocation9 + $0xf4] sm:$0xf]  ;;  %vm1016_vm15 = vcmask 64512  }
  0x38   :  { %1048 = vmatmul.msk.bf16.vlgmr.msrb.gmra.mxu1 %vm183_vm0, %v1401_v21  ;;  %432 = vmatpush.bf16.msra.mxu2 %v1068_v52  ;;  %v1139_v21 = vld [vmem:[#allocation7 + $0xb0] sm:$0xf]  ;;  %v1301_v6 = vld [vmem:[#allocation9 + $0xf8] sm:$0xf0]  ;;  %v1467_v9 = vld [vmem:[#allocation9 + $0xe4] sm:$0xf0] }
  0x39   :  { %460 = vmatpush.bf16.msra.mxu0 %v1072_v57  ;;  %471 = vmatpush.bf16.msra.mxu1 %v1160_v8  ;;  %v1140_v24 = vor.u32 %v1429_v22, %v1139_v21  ;;  %v155_v57 = vperm.slane %v152_v45, 1  ;;  %v1304_v7 = vor.u32 %v1468_v4, %v1301_v6  ;;  %v1291_v8 = vld [vmem:[#allocation9 + $0xe0] sm:$0xf]  ;;  %v1466_v10 = vld [vmem:[#allocation9 + $0xe4] sm:$0xf] }
  0x3a   :  { %v1292_v11 = vor.u32 %v1467_v9, %v1291_v8  ;;  %v1235_v14 = vld [vmem:[#allocation9 + $0x70] sm:$0xf]  ;;  %v1453_v15 = vld [vmem:[#allocation9 + $0x74] sm:$0xf0]  ;;  %v1452_v16 = vld [vmem:[#allocation9 + $0x74] sm:$0xf] }
  0x3b   :  { %445 = vmatpush.bf16.msra.mxu3 %v1140_v24  ;;  %v1237_v18 = vld [vmem:[#allocation9 + $0x78] sm:$0xf0]  ;;  %v1465_v21 = vld [vmem:[#allocation9 + $0xd4] sm:$0xf0]  ;;  %v1464_v22 = vld [vmem:[#allocation9 + $0xd4] sm:$0xf] }
  0x3c   :  { %433 = vmatpush.bf16.msra.mxu2 %v1060_v0  ;;  %v1240_v19 = vor.u32 %v1452_v16, %v1237_v18  ;;  %v1285_v24 = vld [vmem:[#allocation9 + $0xd8] sm:$0xf0]  ;;  %v1451_v27 = vld [vmem:[#allocation9 + $0x64] sm:$0xf0]  ;;  %v1450_v28 = vld [vmem:[#allocation9 + $0x64] sm:$0xf] }
  0x3d   :  { %461 = vmatpush.bf16.msra.mxu0 %v1064_v5  ;;  %472 = vmatpush.bf16.msra.mxu1 %v1152_v20  ;;  %v1300_v5 = vor.u32 %v1469_v3, %v1299_v2  ;;  %v1283_v20 = vld [vmem:[#allocation9 + $0xd0] sm:$0xf]  ;;  %v1288_v25 = vor.u32 %v1464_v22, %v1285_v24  ;;  %v1275_v31 = vld [vmem:[#allocation9 + $0xc0] sm:$0xf]  ;;  %v1462_v35 = vld [vmem:[#allocation9 + $0xc4] sm:$0xf] }
  0x3e   :  { %v1284_v23 = vor.u32 %v1465_v21, %v1283_v20  ;;  %v1449_v39 = vld [vmem:[#allocation9 + $0x54] sm:$0xf0]  ;;  %v1448_v40 = vld [vmem:[#allocation9 + $0x54] sm:$0xf]  ;;  %v1205_v2 = vld [vmem:[#allocation9 + $0x38] sm:$0xf0] }
  0x3f   :  { %446 = vmatpush.bf16.msra.mxu3 %v1132_v30  ;;  %v1229_v30 = vld [vmem:[#allocation9 + $0x68] sm:$0xf0]  ;;  %v1461_v45 = vld [vmem:[#allocation9 + $0xb4] sm:$0xf0]  ;;  %v1251_v4 = vld [vmem:[#allocation9 + $0x90] sm:$0xf] }
  0x40   :  { %434 = vmatpush.bf16.msra.mxu2 %v1052_v12  ;;  %v1293_v12 = vld [vmem:[#allocation9 + $0xe8] sm:$0xf0]  ;;  %v1232_v33 = vor.u32 %v1450_v28, %v1229_v30  ;;  %v1456_v6 = vld [vmem:[#allocation9 + $0x94] sm:$0xf]  ;;  %v1253_v8 = vld [vmem:[#allocation9 + $0x98] sm:$0xf0] }
  0x41   :  { %462 = vmatpush.bf16.msra.mxu0 %v1056_v17  ;;  %473 = vmatpush.bf16.msra.mxu1 %v1144_v26  ;;  %v1296_v13 = vor.u32 %v1466_v10, %v1293_v12  ;;  %v1236_v17 = vor.u32 %v1453_v15, %v1235_v14  ;;  %v1227_v26 = vld [vmem:[#allocation9 + $0x60] sm:$0xf]  ;;  %v1256_v9 = vor.u32 %v1456_v6, %v1253_v8  ;;  %v1442_v12 = vld [vmem:[#allocation9 + $0x24] sm:$0xf]  ;;  %v1197_v14 = vld [vmem:[#allocation9 + $0x28] sm:$0xf0] }
  0x42   :  { %v1228_v29 = vor.u32 %v1451_v27, %v1227_v26  ;;  %v1195_v10 = vld [vmem:[#allocation9 + $0x20] sm:$0xf]  ;;  %v1200_v15 = vor.u32 %v1442_v12, %v1197_v14  ;;  %v1454_v18 = vld [vmem:[#allocation9 + $0x84] sm:$0xf]  ;;  %v1245_v20 = vld [vmem:[#allocation9 + $0x88] sm:$0xf0] }
  0x43   :  { %447 = vmatpush.bf16.msra.mxu3 %v1124_v36  ;;  %v1277_v36 = vld [vmem:[#allocation9 + $0xc8] sm:$0xf0]  ;;  %v1243_v16 = vld [vmem:[#allocation9 + $0x80] sm:$0xf]  ;;  %v1248_v21 = vor.u32 %v1454_v18, %v1245_v20  ;;  %v1187_v22 = vld [vmem:[#allocation9 + $0x10] sm:$0xf] }
  0x44   :  { %695 = vmatpush.bf16.msrb.mxu2 %v1236_v17  ;;  %v1280_v37 = vor.u32 %v1462_v35, %v1277_v36  ;;  %v1455_v17 = vld [vmem:[#allocation9 + $0x84] sm:$0xf0]  ;;  %v1440_v24 = vld [vmem:[#allocation9 + $0x14] sm:$0xf]  ;;  %v1189_v26 = vld [vmem:[#allocation9 + $0x18] sm:$0xf0] }
  0x45   :  { %474 = vmatpush.bf16.msra.mxu1 %v1136_v32  ;;  %723 = vmatpush.bf16.msrb.mxu0 %v1240_v19  ;;  %v1463_v32 = vld [vmem:[#allocation9 + $0xc4] sm:$0xf0]  ;;  %v1244_v19 = vor.u32 %v1455_v17, %v1243_v16  ;;  %v1192_v27 = vor.u32 %v1440_v24, %v1189_v26  ;;  %v1179_v28 = vld [vmem:[#allocation9] sm:$0xf]  ;;  %v1438_v30 = vld [vmem:[#allocation9 + $0x4] sm:$0xf] }
  0x46   :  { %v1276_v34 = vor.u32 %v1463_v32, %v1275_v31  ;;  %v1181_v32 = vld [vmem:[#allocation9 + $0x8] sm:$0xf0]  ;;  %v1477_v35 = vld [vmem:[#allocation10 + $0x38] sm:$0xff]  ;;  %v1484_v36 = vld [vmem:[#allocation10 + $0x70] sm:$0xff] }
  0x47   :  { %448 = vmatpush.bf16.msra.mxu3 %v1116_v42  ;;  %v1221_v42 = vld [vmem:[#allocation9 + $0x58] sm:$0xf0]  ;;  %v1480_v8 = vld [vmem:[#allocation10 + $0x50] sm:$0xff]  ;;  %v1478_v12 = vld [vmem:[#allocation10 + $0x40] sm:$0xff] }
  0x48   :  { %696 = vmatpush.bf16.msrb.mxu2 %v1228_v29  ;;  %v1224_v43 = vor.u32 %v1448_v40, %v1221_v42  ;;  %v1439_v29 = vld [vmem:[#allocation9 + $0x4] sm:$0xf0]  ;;  %v1481_v6 = vld [vmem:[#allocation10 + $0x58] sm:$0xff]  ;;  %v1470_v14 = vld [vmem:[#allocation10] sm:$0xff] }
  0x49   :  { %475 = vmatpush.bf16.msra.mxu1 %v1128_v38  ;;  %724 = vmatpush.bf16.msrb.mxu0 %v1232_v33  ;;  %v1219_v38 = vld [vmem:[#allocation9 + $0x50] sm:$0xf]  ;;  %v1180_v31 = vor.u32 %v1439_v29, %v1179_v28  ;;  %v1184_v33 = vor.u32 %v1438_v30, %v1181_v32  ;;  %v529_v17 = vld [vmem:[%s1814_s6] sm:$0x3] }
  0x4a   :  { %v1220_v41 = vor.u32 %v1449_v39, %v1219_v38  ;;  %v261_v38 = vld [vmem:[%s1812_s4] sm:$0x3]  ;;  %v532_v18 = vperm.slane %v529_v17, 1 }
  0x4b   :  { %709 = vmatpush.bf16.msrb.mxu3 %v1300_v5  ;;  %v1457_v5 = vld [vmem:[#allocation9 + $0x94] sm:$0xf0]  ;;  %v264_v39 = vperm.slane %v261_v38, 1  ;;  %v1492_v16 = vld [vmem:[#allocation12 + $0x30] sm:$0xff] }
  0x4c   :  { %697 = vmatpush.bf16.msrb.mxu2 %v1220_v41 }
  0x4d   :  { %476 = vmatpush.bf16.msra.mxu1 %v1120_v44  ;;  %v1267_v44 = vld [vmem:[#allocation9 + $0xb0] sm:$0xf]  ;;  %725 = vmatpush.bf16.msrb.mxu0 %v1224_v43 }
  0x4f   :  { %710 = vmatpush.bf16.msrb.mxu3 %v1292_v11  ;;  %v1443_v11 = vld [vmem:[#allocation9 + $0x24] sm:$0xf0] }
  0x51   :  { %737 = vmatpush.bf16.msrb.mxu1 %v1304_v7  ;;  %v1252_v7 = vor.u32 %v1457_v5, %v1251_v4  ;;  %v1482_v4 = vld [vmem:[#allocation10 + $0x60] sm:$0xff]  ;;  %v1475_v5 = vld [vmem:[#allocation10 + $0x28] sm:$0xff] }
  0x53   :  { %711 = vmatpush.bf16.msrb.mxu3 %v1284_v23  ;;  %v1441_v23 = vld [vmem:[#allocation9 + $0x14] sm:$0xf0] }
  0x55   :  { %738 = vmatpush.bf16.msrb.mxu1 %v1296_v13  ;;  %v1196_v13 = vor.u32 %v1443_v11, %v1195_v10  ;;  %v1479_v10 = vld [vmem:[#allocation10 + $0x48] sm:$0xff]  ;;  %v1472_v11 = vld [vmem:[#allocation10 + $0x10] sm:$0xff] }
  0x57   :  { %712 = vmatpush.bf16.msrb.mxu3 %v1276_v34  ;;  %v1485_v34 = vld [vmem:[#allocation10 + $0x78] sm:$0xff] }
  0x59   :  { %739 = vmatpush.bf16.msrb.mxu1 %v1288_v25  ;;  %v1188_v25 = vor.u32 %v1441_v23, %v1187_v22  ;;  %v531_v22 = vperm.slane %v529_v17, 0 }
  0x5d   :  { %740 = vmatpush.bf16.msrb.mxu1 %v1280_v37 }
  0xa5   :  { %v196_v46 = vpop.f32.mrf.mxu1 }
  0xa6   :  { %v197_v48 = vadd.f32 %v196_v46, %v154_v47  ;;  %v1460_v46 = vld [vmem:[#allocation9 + $0xb4] sm:$0xf] }
  0xa8   :  { %v219_v50 = vmul.f32 0.01, %v197_v48  ;;  %vm215_vm1 = vcmp.gt.f32.partialorder %v197_v48, 0.0 }
  0xaa   :  { %v223_v53 = vsel %vm215_vm1, %v197_v48, %v219_v50  ;;  %v1269_v48 = vld [vmem:[#allocation9 + $0xb8] sm:$0xf0]  ;;  %v1211_v50 = vld [vmem:[#allocation9 + $0x40] sm:$0xf] }
  0xad   :  { %v198_v49 = vpop.f32.mrf.mxu1 }
  0xae   :  { %v199_v51 = vadd.f32 %v198_v49, %v154_v47  ;;  %v1268_v47 = vor.u32 %v1461_v45, %v1267_v44  ;;  %v1272_v49 = vor.u32 %v1460_v46, %v1269_v48  ;;  %v263_v44 = vperm.slane %v261_v38, 0 }
  0xb0   :  { %v221_v52 = vmul.f32 0.01, %v199_v51  ;;  %vm217_vm2 = vcmp.gt.f32.partialorder %v199_v51, 0.0  ;;  %713 = vmatpush.bf16.msrb.mxu3 %v1268_v47  ;;  %741 = vmatpush.bf16.msrb.mxu1 %v1272_v49 }
  0xb2   :  { %v225_v54 = vsel %vm217_vm2, %v199_v51, %v221_v52  ;;  %v1447_v51 = vld [vmem:[#allocation9 + $0x44] sm:$0xf0]  ;;  %v1446_v52 = vld [vmem:[#allocation9 + $0x44] sm:$0xf] }
  0xb3   :  { %v227_v55 = vpack.c.bf16 %v225_v54, %v223_v53  ;;  %v1212_v53 = vor.u32 %v1447_v51, %v1211_v50  ;;  %v1213_v54 = vld [vmem:[#allocation9 + $0x48] sm:$0xf0] }
  0xb5   :  { %v210_v56 = vpop.f32.mrf.mxu1  ;;  %435 = vmatmul.bf16.vlgmr.msra.gmra.mxu2 %v227_v55  ;;  %463 = vmatmul.bf16.vlgmr.msra.gmra.mxu0 %v227_v55  ;;  %v1216_v55 = vor.u32 %v1446_v52, %v1213_v54 }
  0xb6   :  { %v211_v58 = vadd.f32 %v210_v56, %v155_v57  ;;  %v1259_v56 = vld [vmem:[#allocation9 + $0xa0] sm:$0xf]  ;;  %698 = vmatpush.bf16.msrb.mxu2 %v1212_v53 }
  0xb7   :  { %726 = vmatpush.bf16.msrb.mxu0 %v1216_v55 }
  0xb8   :  { %v220_v60 = vmul.f32 0.01, %v211_v58  ;;  %vm216_vm3 = vcmp.gt.f32.partialorder %v211_v58, 0.0 }
  0xba   :  { %v224_v63 = vsel %vm216_vm3, %v211_v58, %v220_v60  ;;  %v1458_v58 = vld [vmem:[#allocation9 + $0xa4] sm:$0xf]  ;;  %v1261_v60 = vld [vmem:[#allocation9 + $0xa8] sm:$0xf0] }
  0xbd   :  { %v212_v59 = vpop.f32.mrf.mxu1 }
  0xbe   :  { %v213_v61 = vadd.f32 %v212_v59, %v155_v57  ;;  %v1459_v57 = vld [vmem:[#allocation9 + $0xa4] sm:$0xf0] }
  0xbf   :  { %v1260_v59 = vor.u32 %v1459_v57, %v1259_v56 }
  0xc0   :  { %v222_v62 = vmul.f32 0.01, %v213_v61  ;;  %vm218_vm4 = vcmp.gt.f32.partialorder %v213_v61, 0.0 }
  0xc1   :  { %714 = vmatpush.bf16.msrb.mxu3 %v1260_v59 }
  0xc2   :  { %v226_v0 = vsel %vm218_vm4, %v213_v61, %v222_v62  ;;  %v1264_v61 = vor.u32 %v1458_v58, %v1261_v60  ;;  %v1203_v62 = vld [vmem:[#allocation9 + $0x30] sm:$0xf] }
  0xc3   :  { %v228_v1 = vpack.c.bf16 %v226_v0, %v224_v63  ;;  %v1445_v63 = vld [vmem:[#allocation9 + $0x34] sm:$0xf0]  ;;  %v1444_v0 = vld [vmem:[#allocation9 + $0x34] sm:$0xf] }
  0xc4   :  { %742 = vmatpush.bf16.msrb.mxu1 %v1264_v61  ;;  %v1208_v3 = vor.u32 %v1444_v0, %v1205_v2  ;;  %v1483_v2 = vld [vmem:[#allocation10 + $0x68] sm:$0xff] }
  0xc5   :  { %449 = vmatmul.bf16.vlgmr.msra.gmra.mxu3 %v228_v1  ;;  %477 = vmatmul.bf16.vlgmr.msra.gmra.mxu1 %v228_v1  ;;  %v1204_v1 = vor.u32 %v1445_v63, %v1203_v62 }
  0xc6   :  { %727 = vmatpush.bf16.msrb.mxu0 %v1208_v3  ;;  %715 = vmatpush.bf16.msrb.mxu3 %v1252_v7  ;;  %v1476_v3 = vld [vmem:[#allocation10 + $0x30] sm:$0xff]  ;;  %v1474_v7 = vld [vmem:[#allocation10 + $0x20] sm:$0xff] }
  0xc7   :  { %699 = vmatpush.bf16.msrb.mxu2 %v1204_v1 }
  0xc8   :  { %743 = vmatpush.bf16.msrb.mxu1 %v1256_v9  ;;  %v1473_v9 = vld [vmem:[#allocation10 + $0x18] sm:$0xff] }
  0xca   :  { %728 = vmatpush.bf16.msrb.mxu0 %v1200_v15  ;;  %716 = vmatpush.bf16.msrb.mxu3 %v1244_v19  ;;  %v1493_v15 = vld [vmem:[#allocation12 + $0x38] sm:$0xff] }
  0xcb   :  { %700 = vmatpush.bf16.msrb.mxu2 %v1196_v13  ;;  %v1471_v13 = vld [vmem:[#allocation10 + $0x8] sm:$0xff] }
  0xcc   :  { %744 = vmatpush.bf16.msrb.mxu1 %v1248_v21 }
  0xce   :  { %729 = vmatpush.bf16.msrb.mxu0 %v1192_v27  ;;  %911 = vmatpush.bf16.msra.mxu3 %v1485_v34 }
  0xcf   :  { %701 = vmatpush.bf16.msrb.mxu2 %v1188_v25 }
  0xd2   :  { %730 = vmatpush.bf16.msrb.mxu0 %v1184_v33  ;;  %912 = vmatpush.bf16.msra.mxu3 %v1484_v36 }
  0xd3   :  { %702 = vmatpush.bf16.msrb.mxu2 %v1180_v31 }
  0xd6   :  { %913 = vmatpush.bf16.msra.mxu3 %v1483_v2  ;;  %1000 = vmatpush.bf16.msra.mxu0 %v1493_v15  ;;  %v1506_v2 = vld [vmem:[%s1818_s10] ss:$0 sm:$0xff] }
  0xd7   :  { %897 = vmatpush.bf16.msra.mxu2 %v1477_v35 }
  0xda   :  { %914 = vmatpush.bf16.msra.mxu3 %v1482_v4  ;;  %1001 = vmatpush.bf16.msra.mxu0 %v1492_v16 }
  0xdb   :  { %898 = vmatpush.bf16.msra.mxu2 %v1476_v3 }
  0xde   :  { %915 = vmatpush.bf16.msra.mxu3 %v1481_v6 }
  0xdf   :  { %899 = vmatpush.bf16.msra.mxu2 %v1475_v5 }
  0xe2   :  { %916 = vmatpush.bf16.msra.mxu3 %v1480_v8 }
  0xe3   :  { %900 = vmatpush.bf16.msra.mxu2 %v1474_v7 }
  0xe6   :  { %917 = vmatpush.bf16.msra.mxu3 %v1479_v10 }
  0xe7   :  { %901 = vmatpush.bf16.msra.mxu2 %v1473_v9 }
  0xea   :  { %918 = vmatpush.bf16.msra.mxu3 %v1478_v12 }
  0xeb   :  { %902 = vmatpush.bf16.msra.mxu2 %v1472_v11 }
  0xef   :  { %903 = vmatpush.bf16.msra.mxu2 %v1471_v13 }
  0xf3   :  { %904 = vmatpush.bf16.msra.mxu2 %v1470_v14 }
 0x132   :  { %v464_v37 = vpop.f32.mrf.mxu0 }
 0x133   :  { %v465_v42 = vadd.f32 %v464_v37, %v264_v39 }
 0x138   :  { %v436_v40 = vpop.f32.mrf.mxu2 }
 0x139   :  { %v437_v49 = vadd.f32 %v436_v40, %v263_v44 }
 0x13a   :  { %v466_v43 = vpop.f32.mrf.mxu0 }
 0x13b   :  { %v467_v47 = vadd.f32 %v466_v43, %v264_v39 }
 0x140   :  { %v438_v52 = vpop.f32.mrf.mxu2 }
 0x141   :  { %v439_v55 = vadd.f32 %v438_v52, %v263_v44  ;;  %v1505_v52 = vld [vmem:[%s1816_s8] ss:$0 sm:$0xff] }
 0x142   :  { %v478_v41 = vpop.f32.mrf.mxu1 }
 0x143   :  { %v479_v45 = vadd.f32 %v478_v41, %v465_v42 }
 0x145   :  { %v488_v50 = vmul.f32 0.01, %v479_v45  ;;  %vm484_vm5 = vcmp.gt.f32.partialorder %v479_v45, 0.0 }
 0x147   :  { %v492_v56 = vsel %vm484_vm5, %v479_v45, %v488_v50  ;;  %v1487_v50 = vld [vmem:[#allocation12 + $0x8] sm:$0xff] }
 0x148   :  { %v450_v46 = vpop.f32.mrf.mxu3 }
 0x149   :  { %v451_v53 = vadd.f32 %v450_v46, %v437_v49  ;;  %v1491_v46 = vld [vmem:[#allocation12 + $0x28] sm:$0xff]  ;;  %v1488_v49 = vld [vmem:[#allocation12 + $0x10] sm:$0xff] }
 0x14a   :  { %v480_v48 = vpop.f32.mrf.mxu1  ;;  %1002 = vmatpush.bf16.msra.mxu0 %v1491_v46 }
 0x14b   :  { %v481_v51 = vadd.f32 %v480_v48, %v467_v47  ;;  %v487_v60 = vmul.f32 0.01, %v451_v53  ;;  %vm483_vm7 = vcmp.gt.f32.partialorder %v451_v53, 0.0  ;;  %v1490_v47 = vld [vmem:[#allocation12 + $0x20] sm:$0xff]  ;;  %v1489_v48 = vld [vmem:[#allocation12 + $0x18] sm:$0xff] }
 0x14d   :  { %vm486_vm6 = vcmp.gt.f32.partialorder %v481_v51, 0.0  ;;  %v490_v54 = vmul.f32 0.01, %v481_v51  ;;  %v491_v63 = vsel %vm483_vm7, %v451_v53, %v487_v60 }
 0x14e   :  { %1003 = vmatpush.bf16.msra.mxu0 %v1490_v47 }
 0x14f   :  { %v494_v57 = vsel %vm486_vm6, %v481_v51, %v490_v54  ;;  %v1486_v51 = vld [vmem:[#allocation12] sm:$0xff] }
 0x150   :  { %v452_v58 = vpop.f32.mrf.mxu3  ;;  %v496_v59 = vpack.c.bf16 %v494_v57, %v492_v56 }
 0x151   :  { %v453_v61 = vadd.f32 %v452_v58, %v439_v55 }
 0x152   :  { %717 = vmatmul.bf16.vlgmr.msrb.gmra.mxu3 %v496_v59  ;;  %745 = vmatmul.bf16.vlgmr.msrb.gmra.mxu1 %v496_v59 }
 0x153   :  { %vm485_vm8 = vcmp.gt.f32.partialorder %v453_v61, 0.0  ;;  %v489_v62 = vmul.f32 0.01, %v453_v61  ;;  %1004 = vmatpush.bf16.msra.mxu0 %v1489_v48 }
 0x155   :  { %v493_v0 = vsel %vm485_vm8, %v453_v61, %v489_v62 }
 0x156   :  { %v495_v1 = vpack.c.bf16 %v493_v0, %v491_v63 }
 0x157   :  { %1005 = vmatpush.bf16.msra.mxu0 %v1488_v49 }
 0x158   :  { %703 = vmatmul.bf16.vlgmr.msrb.gmra.mxu2 %v495_v1  ;;  %731 = vmatmul.bf16.vlgmr.msrb.gmra.mxu0 %v495_v1 }
 0x15b   :  { %1006 = vmatpush.bf16.msra.mxu0 %v1487_v50 }
 0x15f   :  { %1007 = vmatpush.bf16.msra.mxu0 %v1486_v51 }
 0x1cf   :  { %v746_v19 = vpop.f32.mrf.mxu1 }
 0x1d5   :  { %v732_v20 = vpop.f32.mrf.mxu0  ;;  %v718_v23 = vpop.f32.mrf.mxu3 }
 0x1d6   :  { %v733_v21 = vadd.f32 %v732_v20, %v532_v18 }
 0x1d7   :  { %v748_v29 = vpop.f32.mrf.mxu1 }
 0x1d8   :  { %v747_v25 = vadd.f32 %v746_v19, %v733_v21 }
 0x1da   :  { %v756_v30 = vmul.f32 0.01, %v747_v25  ;;  %vm752_vm9 = vcmp.gt.f32.partialorder %v747_v25, 0.0 }
 0x1db   :  { %v704_v24 = vpop.f32.mrf.mxu2 }
 0x1dc   :  { %v705_v27 = vadd.f32 %v704_v24, %v531_v22  ;;  %v760_v35 = vsel %vm752_vm9, %v747_v25, %v756_v30 }
 0x1dd   :  { %v734_v26 = vpop.f32.mrf.mxu0  ;;  %v720_v38 = vpop.f32.mrf.mxu3 }
 0x1de   :  { %v735_v28 = vadd.f32 %v734_v26, %v532_v18  ;;  %v719_v32 = vadd.f32 %v718_v23, %v705_v27 }
 0x1e0   :  { %v749_v31 = vadd.f32 %v748_v29, %v735_v28  ;;  %v755_v40 = vmul.f32 0.01, %v719_v32  ;;  %vm751_vm11 = vcmp.gt.f32.partialorder %v719_v32, 0.0 }
 0x1e2   :  { %vm754_vm10 = vcmp.gt.f32.partialorder %v749_v31, 0.0  ;;  %v758_v33 = vmul.f32 0.01, %v749_v31  ;;  %v759_v43 = vsel %vm751_vm11, %v719_v32, %v755_v40 }
 0x1e3   :  { %v706_v34 = vpop.f32.mrf.mxu2 }
 0x1e4   :  { %v762_v36 = vsel %vm754_vm10, %v749_v31, %v758_v33  ;;  %v707_v37 = vadd.f32 %v706_v34, %v531_v22 }
 0x1e5   :  { %v764_v39 = vpack.c.bf16 %v762_v36, %v760_v35 }
 0x1e6   :  { %v721_v41 = vadd.f32 %v720_v38, %v707_v37 }
 0x1e7   :  { %919 = vmatmul.bf16.vlgmr.msra.gmra.mxu3 %v764_v39 }
 0x1e8   :  { %vm753_vm12 = vcmp.gt.f32.partialorder %v721_v41, 0.0  ;;  %v757_v42 = vmul.f32 0.01, %v721_v41 }
 0x1ea   :  { %v761_v44 = vsel %vm753_vm12, %v721_v41, %v757_v42 }
 0x1eb   :  { %v763_v45 = vpack.c.bf16 %v761_v44, %v759_v43 }
 0x1ed   :  { %905 = vmatmul.bf16.vlgmr.msra.gmra.mxu2 %v763_v45 }
 0x26a   :  { %v920_v53 = vpop.f32.mrf.mxu3 }
 0x270   :  { %v906_v54 = vpop.f32.mrf.mxu2 }
 0x271   :  { %v907_v55 = vadd.f32 %v1505_v52, %v906_v54 }
 0x272   :  { %v922_v59 = vpop.f32.mrf.mxu3 }
 0x273   :  { %v921_v56 = vadd.f32 %v920_v53, %v907_v55 }
 0x275   :  { %v927_v60 = vmul.f32 0.01, %v921_v56  ;;  %vm925_vm13 = vcmp.gt.f32.partialorder %v921_v56, 0.0 }
 0x277   :  { %v929_v63 = vsel %vm925_vm13, %v921_v56, %v927_v60 }
 0x278   :  { %v908_v57 = vpop.f32.mrf.mxu2 }
 0x279   :  { %v909_v58 = vadd.f32 %v1505_v52, %v908_v57 }
 0x27b   :  { %v923_v61 = vadd.f32 %v922_v59, %v909_v58 }
 0x27d   :  { %vm926_vm14 = vcmp.gt.f32.partialorder %v923_v61, 0.0  ;;  %v928_v62 = vmul.f32 0.01, %v923_v61 }
 0x27f   :  { %v930_v0 = vsel %vm926_vm14, %v923_v61, %v928_v62 }
 0x280   :  { %v931_v1 = vpack.c.bf16 %v930_v0, %v929_v63 }
 0x282   :  { %1008 = vmatmul.bf16.vlgmr.msra.gmra.mxu0 %v931_v1 }
 0x2ff   :  { %v1009_v3 = vpop.f32.mrf.mxu0 }
 0x300   :  { %v1010_v4 = vadd.f32 %v1506_v2, %v1009_v3 }
 0x302   :  { %1507 = vtanh.f32 %v1010_v4 }
 0x307   :  { %v1011_v5 = vpop.f32.mrf.mxu0 }
 0x308   :  { %v1508_v6 = vpop.eup %1507  ;;  %v1012_v7 = vadd.f32 %v1506_v2, %v1011_v5 }
 0x309   :  { %1017 = vst.msk [vmem:[%s1819_s11] sm:$0xff] %vm1016_vm15, %v1508_v6 }
 0x30a   :  { %1509 = vtanh.f32 %v1012_v7 }
 0x310   :  { %v1510_v8 = vpop.eup %1509 }
 0x311   :  { %1018 = vst.msk [vmem:[%s1819_s11 + $0x8] sm:$0xff] %vm1016_vm15, %v1510_v8 }
 0x312   :  { %1023 = vsyncpa [#allocation3], 1 }
 0x313   :  { %1024 = vsyncpa [#allocation5], 1 }
 0x314   :  { %1025 = vsyncpa [#allocation8], 1 }
 0x315   :  { %1026 = vsyncpa [#allocation11], 1 }

</bundles_post_ra>
